<compile_context>
chip_gen: v7x
topology: tpu7x:2x2x1
jax: 0.10.0
libtpu: 0.0.40
codegen_flags: <defaults>
</compile_context>

<pallas_src>
import math

import jax
import jax.numpy as jnp
from jax.experimental import pallas as pl
from jax.experimental.pallas import tpu as pltpu


# ---------------------------------------------------------------------------
# Kernels
# ---------------------------------------------------------------------------

def mlp_kernel(x_ref, w1_ref, b1_ref, w2_ref, b2_ref, ha_ref, ha_bf16_ref):
    # Linear 1 + ReLU (feature dims are already lane-padded to 128 in the wrapper).
    h1 = jnp.dot(x_ref[...], w1_ref[...], preferred_element_type=jnp.float32)
    h1 = jnp.maximum(h1 + b1_ref[...], 0.0)
    # Linear 2 (no activation on the last MLP layer).
    ha = jnp.dot(h1, w2_ref[...], preferred_element_type=jnp.float32) + b2_ref[...]
    ha_ref[...] = ha.astype(ha_ref.dtype)
    # bf16 copy consumed by the spmm kernel (avoids a separate cast pass over HBM).
    ha_bf16_ref[...] = ha.astype(jnp.bfloat16)


def spmm_kernel(adj_ref, ha_ref, hp_ref, acc_ref):
    # h_p = adj @ h_a, K-tiled with an f32 accumulator resident in VMEM.
    k = pl.program_id(1)

    @pl.when(k == 0)
    def _():
        acc_ref[...] = jnp.zeros_like(acc_ref)

    acc_ref[...] += jnp.dot(
        adj_ref[...], ha_ref[...], preferred_element_type=jnp.float32
    )

    @pl.when(k == pl.num_programs(1) - 1)
    def _():
        hp_ref[...] = acc_ref[...].astype(hp_ref.dtype)


# ---------------------------------------------------------------------------
# Wrapper
# ---------------------------------------------------------------------------

def _round_up(a, b):
    return (a + b - 1) // b * b


def _fit_tile(n, preferred, base):
    # Largest multiple of `base` that is <= preferred and divides n (n is a multiple of base).
    t = max(base, (min(preferred, n) // base) * base)
    while n % t != 0:
        t -= base
    return t


def _pad2(a, rows, cols):
    return jnp.pad(a, ((0, rows - a.shape[0]), (0, cols - a.shape[1])))


def sugrl_fast_forward(x, adj, params, *, tm=256, tk=1024, tm_mlp=1024):
    """Returns (h_a, h_p) matching SUGRL_Fast.forward in eval mode."""
    (w1, b1), (w2, b2) = params
    N, n_in = x.shape
    h1 = w1.shape[1]
    h2 = w2.shape[1]

    # --- tiling / padding ----------------------------------------------------
    base = 256
    Np = _round_up(N, base)
    tm = _fit_tile(Np, tm, base)          # spmm output-row tile
    tk = _fit_tile(Np, tk, base)          # spmm contraction tile
    tm_mlp = _fit_tile(Np, tm_mlp, base)  # MLP row tile

    h1p = _round_up(h1, 128)              # lane-dense hidden width
    h2p = _round_up(h2, 128)              # lane-dense output width

    # Zero-padded weights: padded hidden units produce exactly 0 after ReLU and the
    # padded output columns are exactly 0, so results in [:, :h2] are unchanged.
    w1p = _pad2(w1, n_in, h1p)
    b1p = _pad2(b1.reshape(1, -1), 1, h1p)
    w2p = _pad2(w2, h1p, h2p)
    b2p = _pad2(b2.reshape(1, -1), 1, h2p)

    xp = x if Np == N else jnp.pad(x, ((0, Np - N), (0, 0)))
    adj_b = adj.astype(jnp.bfloat16)
    if Np != N:
        adj_b = jnp.pad(adj_b, ((0, Np - N), (0, Np - N)))

    # --- MLP: h_a = ReLU(x @ W1 + b1) @ W2 + b2 -------------------------------
    ha_pad, ha_bf16 = pl.pallas_call(
        mlp_kernel,
        out_shape=(
            jax.ShapeDtypeStruct((Np, h2p), jnp.float32),
            jax.ShapeDtypeStruct((Np, h2p), jnp.bfloat16),
        ),
        grid_spec=pltpu.PrefetchScalarGridSpec(
            num_scalar_prefetch=0,
            grid=(Np // tm_mlp,),
            in_specs=[
                pl.BlockSpec((tm_mlp, n_in), lambda i: (i, 0)),  # row tile of x
                pl.BlockSpec((n_in, h1p), lambda i: (0, 0)),     # full W1 (in, out)
                pl.BlockSpec((1, h1p), lambda i: (0, 0)),        # b1
                pl.BlockSpec((h1p, h2p), lambda i: (0, 0)),      # full W2 (in, out)
                pl.BlockSpec((1, h2p), lambda i: (0, 0)),        # b2
            ],
            out_specs=[
                pl.BlockSpec((tm_mlp, h2p), lambda i: (i, 0)),
                pl.BlockSpec((tm_mlp, h2p), lambda i: (i, 0)),
            ],
        ),
        compiler_params=pltpu.CompilerParams(dimension_semantics=("parallel",)),
    )(xp, w1p, b1p, w2p, b2p)

    # --- spmm: h_p = adj @ h_a  (bf16 inputs, f32 accumulation, K-tiled) ------
    hp_pad = pl.pallas_call(
        spmm_kernel,
        out_shape=jax.ShapeDtypeStruct((Np, h2p), jnp.float32),
        grid_spec=pltpu.PrefetchScalarGridSpec(
            num_scalar_prefetch=0,
            grid=(Np // tm, Np // tk),
            in_specs=[
                pl.BlockSpec((tm, tk), lambda i, k: (i, k)),     # adj tile
                pl.BlockSpec((tk, h2p), lambda i, k: (k, 0)),    # h_a K-tile (bf16)
            ],
            out_specs=pl.BlockSpec((tm, h2p), lambda i, k: (i, 0)),
            scratch_shapes=[pltpu.VMEM((tm, h2p), jnp.float32)],
        ),
        compiler_params=pltpu.CompilerParams(
            dimension_semantics=("parallel", "arbitrary")
        ),
    )(adj_b, ha_bf16)

    return ha_pad[:N, :h2], hp_pad[:N, :h2]


# ---------------------------------------------------------------------------
# Parameter init (matches torch: xavier_uniform_ weights, zero bias)
# ---------------------------------------------------------------------------

def xavier_uniform(key, fan_in, fan_out, dtype=jnp.float32):
    bound = math.sqrt(6.0 / (fan_in + fan_out))
    return jax.random.uniform(
        key, (fan_in, fan_out), dtype=dtype, minval=-bound, maxval=bound
    )


def make_mlp_params(key, n_in, cfg, dtype=jnp.float32):
    params = []
    in_c = n_in
    keys = jax.random.split(key, len(cfg))
    for k, out_c in zip(keys, cfg):
        w = xavier_uniform(k, in_c, out_c, dtype)   # stored (in, out)
        b = jnp.zeros((1, out_c), dtype)            # bias filled with 0.0
        params.append((w, b))
        in_c = out_c
    return params


if __name__ == "__main__":
    key = jax.random.PRNGKey(0)
    k_x, k_adj, k_w = jax.random.split(key, 3)

    # Small graph: N nodes, n_in input features, cfg hidden sizes.
    N, n_in = 512, 32
    cfg = [64, 32]

    x = jax.random.normal(k_x, (N, n_in), dtype=jnp.float32)

    # Dense, row-normalized random adjacency (stands in for torch.spmm's sparse adj).
    adj_raw = (jax.random.uniform(k_adj, (N, N)) < 0.05).astype(jnp.float32)
    adj_raw = adj_raw + jnp.eye(N, dtype=jnp.float32)
    adj = adj_raw / jnp.sum(adj_raw, axis=1, keepdims=True)

    params = make_mlp_params(k_w, n_in, cfg)

    h_a, h_p = jax.block_until_ready(sugrl_fast_forward(x, adj, params))

    # Pure-JAX reference check (full f32 precision).
    (w1, b1), (w2, b2) = params
    with jax.default_matmul_precision("highest"):
        ha_ref = jnp.maximum(x @ w1 + b1, 0.0) @ w2 + b2
        hp_ref = adj @ ha_ref

    assert h_a.shape == (N, cfg[-1]) and h_p.shape == (N, cfg[-1])
    assert jnp.allclose(h_a, ha_ref, atol=1e-4, rtol=1e-4)
    # spmm uses bf16 adjacency / h_a with f32 accumulation -> looser tolerance.
    assert jnp.allclose(h_p, hp_ref, atol=1e-2, rtol=1e-2)

    print("KERNEL_OK")
</pallas_src>

<mosaic_0001>
module attributes {stable_mosaic.version = 11 : i64} {
  func.func @mlp_kernel(%arg0: i32, %arg1: memref<512x32xf32, #tpu.memory_space<vmem>>, %arg2: memref<32x128xf32, #tpu.memory_space<vmem>>, %arg3: memref<1x128xf32, #tpu.memory_space<vmem>>, %arg4: memref<128x128xf32, #tpu.memory_space<vmem>>, %arg5: memref<1x128xf32, #tpu.memory_space<vmem>>, %arg6: memref<512x128xf32, #tpu.memory_space<vmem>>, %arg7: memref<512x128xbf16, #tpu.memory_space<vmem>>) attributes {dimension_semantics = [#tpu.dimension_semantics<parallel>], iteration_bounds = array<i64: 1>, scalar_prefetch = 0 : i64, scratch_operands = 0 : i64, tpu.core_type = #tpu.core_type<tc>, window_params = [{transform_indices = @transform_0, window_bounds = array<i64: 512, 32>}, {pipeline_mode = #tpu.pipeline_mode<synchronous>, transform_indices = @transform_1, window_bounds = array<i64: 32, 128>}, {pipeline_mode = #tpu.pipeline_mode<synchronous>, transform_indices = @transform_2, window_bounds = array<i64: 1, 128>}, {pipeline_mode = #tpu.pipeline_mode<synchronous>, transform_indices = @transform_3, window_bounds = array<i64: 128, 128>}, {pipeline_mode = #tpu.pipeline_mode<synchronous>, transform_indices = @transform_4, window_bounds = array<i64: 1, 128>}, {transform_indices = @transform_5, window_bounds = array<i64: 512, 128>}, {transform_indices = @transform_6, window_bounds = array<i64: 512, 128>}]} {
    %c0 = arith.constant 0 : index
    %c0_0 = arith.constant 0 : index
    %0 = vector.load %arg1[%c0, %c0_0] : memref<512x32xf32, #tpu.memory_space<vmem>>, vector<512x32xf32>
    %c0_1 = arith.constant 0 : index
    %c0_2 = arith.constant 0 : index
    %1 = vector.load %arg2[%c0_1, %c0_2] : memref<32x128xf32, #tpu.memory_space<vmem>>, vector<32x128xf32>
    %cst = arith.constant dense<0.000000e+00> : vector<512x128xf32>
    %2 = tpu.matmul %0, %1, %cst {dimension_numbers = #tpu.dot_dimension_numbers<[1], [0], [0], [1], [0, 0, 1, 1], [], []>} : vector<512x32xf32>, vector<32x128xf32>, vector<512x128xf32> -> vector<512x128xf32>
    %c0_3 = arith.constant 0 : index
    %c0_4 = arith.constant 0 : index
    %3 = vector.load %arg3[%c0_3, %c0_4] : memref<1x128xf32, #tpu.memory_space<vmem>>, vector<1x128xf32>
    %4 = vector.broadcast %3 : vector<1x128xf32> to vector<512x128xf32>
    %5 = arith.addf %2, %4 : vector<512x128xf32>
    %cst_5 = arith.constant 0.000000e+00 : f32
    %6 = vector.broadcast %cst_5 : f32 to vector<512x128xf32>
    %7 = arith.maximumf %5, %6 : vector<512x128xf32>
    %c0_6 = arith.constant 0 : index
    %c0_7 = arith.constant 0 : index
    %8 = vector.load %arg4[%c0_6, %c0_7] : memref<128x128xf32, #tpu.memory_space<vmem>>, vector<128x128xf32>
    %cst_8 = arith.constant dense<0.000000e+00> : vector<512x128xf32>
    %9 = tpu.matmul %7, %8, %cst_8 {dimension_numbers = #tpu.dot_dimension_numbers<[1], [0], [0], [1], [0, 0, 1, 1], [], []>} : vector<512x128xf32>, vector<128x128xf32>, vector<512x128xf32> -> vector<512x128xf32>
    %c0_9 = arith.constant 0 : index
    %c0_10 = arith.constant 0 : index
    %10 = vector.load %arg5[%c0_9, %c0_10] : memref<1x128xf32, #tpu.memory_space<vmem>>, vector<1x128xf32>
    %11 = vector.broadcast %10 : vector<1x128xf32> to vector<512x128xf32>
    %12 = arith.addf %9, %11 : vector<512x128xf32>
    %c0_11 = arith.constant 0 : index
    %c0_12 = arith.constant 0 : index
    %13 = vector.load %arg6[%c0_11, %c0_12] : memref<512x128xf32, #tpu.memory_space<vmem>>, vector<512x128xf32>
    tpu.vector_store %arg6[%c0_11, %c0_12], %12 {strides = array<i32>} : memref<512x128xf32, #tpu.memory_space<vmem>>, vector<512x128xf32>,
    %14 = arith.truncf %12 : vector<512x128xf32> to vector<512x128xbf16>
    %c0_13 = arith.constant 0 : index
    %c0_14 = arith.constant 0 : index
    %15 = vector.load %arg7[%c0_13, %c0_14] : memref<512x128xbf16, #tpu.memory_space<vmem>>, vector<512x128xbf16>
    tpu.vector_store %arg7[%c0_13, %c0_14], %14 {strides = array<i32>} : memref<512x128xbf16, #tpu.memory_space<vmem>>, vector<512x128xbf16>,
    return
  }
  func.func @transform_0(%arg0: i32) -> (i32, i32) {
    %c0_i32 = arith.constant 0 : i32
    %c0_i32_0 = arith.constant 0 : i32
    return %arg0, %c0_i32 : i32, i32
  }
  func.func @transform_1(%arg0: i32) -> (i32, i32) {
    %c0_i32 = arith.constant 0 : i32
    %c0_i32_0 = arith.constant 0 : i32
    %c0_i32_1 = arith.constant 0 : i32
    return %c0_i32, %c0_i32_0 : i32, i32
  }
  func.func @transform_2(%arg0: i32) -> (i32, i32) {
    %c0_i32 = arith.constant 0 : i32
    %c0_i32_0 = arith.constant 0 : i32
    %c0_i32_1 = arith.constant 0 : i32
    return %c0_i32, %c0_i32_0 : i32, i32
  }
  func.func @transform_3(%arg0: i32) -> (i32, i32) {
    %c0_i32 = arith.constant 0 : i32
    %c0_i32_0 = arith.constant 0 : i32
    %c0_i32_1 = arith.constant 0 : i32
    return %c0_i32, %c0_i32_0 : i32, i32
  }
  func.func @transform_4(%arg0: i32) -> (i32, i32) {
    %c0_i32 = arith.constant 0 : i32
    %c0_i32_0 = arith.constant 0 : i32
    %c0_i32_1 = arith.constant 0 : i32
    return %c0_i32, %c0_i32_0 : i32, i32
  }
  func.func @transform_5(%arg0: i32) -> (i32, i32) {
    %c0_i32 = arith.constant 0 : i32
    %c0_i32_0 = arith.constant 0 : i32
    return %arg0, %c0_i32 : i32, i32
  }
  func.func @transform_6(%arg0: i32) -> (i32, i32) {
    %c0_i32 = arith.constant 0 : i32
    %c0_i32_0 = arith.constant 0 : i32
    return %arg0, %c0_i32 : i32, i32
  }
}

</mosaic_0001>

<bundles_post_ra>
// kernel: tpu_custom_call.1
= control target key start
LH: loop header
LB: loop body
LE: loop exit
PB: predicated region body
PF: predicated region fallthrough
CT: control target
= control target key end

     0   :  { %12 = vsyncpa [#allocation3], 0  ;;  %vm99_vm0 = vcmask 261120   ;;  %s2966_s0 = inlined_call_operand.vmem [shape: f32[512,32], index: 0, kind: input, shape index: {}]   ;;  %s2967_s1 = inlined_call_operand.vmem [shape: f32[32,128], index: 1, kind: input, shape index: {}]   ;;  %s2968_s2 = inlined_call_operand.vmem [shape: f32[1,128], index: 2, kind: input, shape index: {}]   ;;  %s2969_s3 = inlined_call_operand.vmem [shape: f32[128,128], index: 3, kind: input, shape index: {}]   ;;  %s2970_s4 = inlined_call_operand.vmem [shape: f32[1,128], index: 4, kind: input, shape index: {}]   ;;  %s2971_s5 = inlined_call_operand.hbm [shape: f32[512,128], index: 5, kind: output, shape index: {0}]   ;;  %s2972_s6 = inlined_call_operand.hbm [shape: bf16[512,128], index: 6, kind: output, shape index: {1}]  }
   0x1   :  { %v88_v0 = vld [vmem:[%s2967_s1] sm:$0xff]  ;;  %v89_v1 = vld [vmem:[%s2967_s1 + $0x8] sm:$0xff]  ;;  %v90_v2 = vld [vmem:[%s2967_s1 + $0x10] sm:$0xff] }
   0x2   :  { %v2330_v3 = vpack.c.bf16 %v89_v1, %v88_v0  ;;  %v91_v4 = vld [vmem:[%s2967_s1 + $0x18] sm:$0xff]  ;;  %v24_v5 = vld [vmem:[%s2966_s0] sm:$0xff]  ;;  %v25_v7 = vld [vmem:[%s2966_s0 + $0x8] sm:$0xff] }
   0x3   :  { %v2334_v6 = vpack.c.bf16 %v91_v4, %v90_v2  ;;  %2106 = vmatprep.mubr.msk.f32.mxu0 %vm99_vm0, %v24_v5  ;;  %v26_v8 = vld [vmem:[%s2966_s0 + $0x10] sm:$0xff]  ;;  %v27_v9 = vld [vmem:[%s2966_s0 + $0x18] sm:$0xff]  ;;  %v28_v10 = vld [vmem:[%s2966_s0 + $0x20] sm:$0xff] }
   0x4   :  { %2331 = vmatprep.subr.bf16.mxu0 %v2330_v3  ;;  %v29_v11 = vld [vmem:[%s2966_s0 + $0x28] sm:$0xff]  ;;  %v30_v12 = vld [vmem:[%s2966_s0 + $0x30] sm:$0xff]  ;;  %v31_v13 = vld [vmem:[%s2966_s0 + $0x38] sm:$0xff] }
   0x5   :  { %2333 = vmatpush3.bf16.msra.mxu0 %v2330_v3  ;;  %v32_v14 = vld [vmem:[%s2966_s0 + $0x40] sm:$0xff]  ;;  %v742_v16 = vld [vmem:[%s2969_s3 + $0x8] sm:$0xff]  ;;  %v743_v17 = vld [vmem:[%s2969_s3 + $0x10] sm:$0xff] }
   0x6   :  { %2335 = vmatprep.subr.bf16.mxu0 %v2334_v6  ;;  %v741_v15 = vld [vmem:[%s2969_s3] sm:$0xff]  ;;  %v744_v18 = vld [vmem:[%s2969_s3 + $0x18] sm:$0xff]  ;;  %v33_v19 = vld [vmem:[%s2966_s0 + $0x48] sm:$0xff] }
   0x7   :  { %v2338_v20 = vpack.c.bf16 %v742_v16, %v741_v15  ;;  %v34_v21 = vld [vmem:[%s2966_s0 + $0x50] sm:$0xff]  ;;  %v2342_v22 = vpack.c.bf16 %v744_v18, %v743_v17  ;;  %v745_v23 = vld [vmem:[%s2969_s3 + $0x20] sm:$0xff]  ;;  %v746_v24 = vld [vmem:[%s2969_s3 + $0x28] sm:$0xff] }
   0x9   :  { %2337 = vmatpush3.bf16.msra.mxu0 %v2334_v6  ;;  %2370 = vmatprep.subr.bf16.mxu1 %v2338_v20 }
   0xa   :  { %2339 = vmatprep.subr.bf16.mxu0 %v2338_v20  ;;  %2378 = vmatpush3.bf16.msra.mxu1 %v2338_v20 }
   0xc   :  { %2107 = vmatmul.mubr.msk.f32.vlgmr.msra.gmra.mrb[0].mxu0 %vm99_vm0, %v25_v7 }
   0xd   :  { %2109 = vmatprep.mubr.msk.f32.mxu0 %vm99_vm0, %v26_v8 }
  0x10   :  { %2110 = vmatmul.mubr.msk.f32.gmra.mrb[2].mxu0 %vm99_vm0, %v27_v9 }
  0x11   :  { %2112 = vmatprep.mubr.msk.f32.mxu0 %vm99_vm0, %v28_v10 }
  0x14   :  { %2113 = vmatmul.mubr.msk.f32.gmra.mrb[4].mxu0 %vm99_vm0, %v29_v11 }
  0x15   :  { %2115 = vmatprep.mubr.msk.f32.mxu0 %vm99_vm0, %v30_v12 }
  0x18   :  { %2116 = vmatmul.mubr.msk.f32.gmra.mrb[6].mxu0 %vm99_vm0, %v31_v13 }
  0x19   :  { %2118 = vmatprep.mubr.msk.f32.mxu0 %vm99_vm0, %v32_v14 }
  0x1c   :  { %2119 = vmatmul.mubr.msk.f32.gmra.mrb[8].mxu0 %vm99_vm0, %v33_v19 }
  0x1d   :  { %13 = vsyncpa [#allocation5], 0  ;;  %2121 = vmatprep.mubr.msk.f32.mxu0 %vm99_vm0, %v34_v21  ;;  %v35_v25 = vld [vmem:[%s2966_s0 + $0x58] sm:$0xff]  ;;  %2341 = vmatpush3.bf16.msra.mxu0 %v2338_v20  ;;  %v36_v26 = vld [vmem:[%s2966_s0 + $0x60] sm:$0xff]  ;;  %v2346_v27 = vpack.c.bf16 %v746_v24, %v745_v23  ;;  %s2441_s15 = smov [#allocation4]  }
  0x1e   :  { %2343 = vmatprep.subr.bf16.mxu0 %v2342_v22  ;;  %2371 = vmatprep.subr.bf16.mxu1 %v2342_v22  ;;  %v747_v28 = vld [vmem:[%s2969_s3 + $0x30] sm:$0xff]  ;;  %v748_v29 = vld [vmem:[%s2969_s3 + $0x38] sm:$0xff]  ;;  %v37_v30 = vld [vmem:[%s2966_s0 + $0x68] sm:$0xff]  ;;  %s1550_s16 = sshll.u32 %s2441_s15, 4  ;;  %s2935_s16 = int_to_ptr.vmem [resolvable:$true] %s1550_s16 }
  0x1f   :  { %2379 = vmatpush3.bf16.msra.mxu1 %v2342_v22  ;;  %v38_v31 = vld [vmem:[%s2966_s0 + $0x70] sm:$0xff]  ;;  %v2350_v32 = vpack.c.bf16 %v748_v29, %v747_v28  ;;  %v749_v33 = vld [vmem:[%s2969_s3 + $0x40] sm:$0xff]  ;;  %v750_v34 = vld [vmem:[%s2969_s3 + $0x48] sm:$0xff] }
  0x20   :  { %2122 = vmatmul.mubr.msk.f32.gmra.mrb[10].mxu0 %vm99_vm0, %v35_v25  ;;  %2372 = vmatprep.subr.bf16.mxu1 %v2346_v27  ;;  %v39_v35 = vld [vmem:[%s2966_s0 + $0x78] sm:$0xff]  ;;  %v40_v36 = vld [vmem:[%s2966_s0 + $0x80] sm:$0xff]  ;;  %v2354_v37 = vpack.c.bf16 %v750_v34, %v749_v33  ;;  %v751_v38 = vld [vmem:[%s2969_s3 + $0x50] sm:$0xff] }
  0x21   :  { %2124 = vmatprep.mubr.msk.f32.mxu0 %vm99_vm0, %v36_v26  ;;  %2345 = vmatpush3.bf16.msra.mxu0 %v2342_v22  ;;  %v752_v39 = vld [vmem:[%s2969_s3 + $0x58] sm:$0xff]  ;;  %v41_v40 = vld [vmem:[%s2966_s0 + $0x88] sm:$0xff]  ;;  %v42_v41 = vld [vmem:[%s2966_s0 + $0x90] sm:$0xff] }
  0x22   :  { %2347 = vmatprep.subr.bf16.mxu0 %v2346_v27  ;;  %v2358_v42 = vpack.c.bf16 %v752_v39, %v751_v38  ;;  %v753_v43 = vld [vmem:[%s2969_s3 + $0x60] sm:$0xff]  ;;  %v754_v44 = vld [vmem:[%s2969_s3 + $0x68] sm:$0xff]  ;;  %v43_v45 = vld [vmem:[%s2966_s0 + $0x98] sm:$0xff] }
  0x23   :  { %2380 = vmatpush3.bf16.msra.mxu1 %v2346_v27  ;;  %v44_v46 = vld [vmem:[%s2966_s0 + $0xa0] sm:$0xff]  ;;  %v2362_v47 = vpack.c.bf16 %v754_v44, %v753_v43  ;;  %v45_v48 = vld [vmem:[%s2966_s0 + $0xa8] sm:$0xff]  ;;  %v46_v49 = vld [vmem:[%s2966_s0 + $0xb0] sm:$0xff] }
  0x24   :  { %2125 = vmatmul.mubr.msk.f32.gmra.mrb[12].mxu0 %vm99_vm0, %v37_v30  ;;  %2373 = vmatprep.subr.bf16.mxu1 %v2350_v32  ;;  %v47_v50 = vld [vmem:[%s2966_s0 + $0xb8] sm:$0xff]  ;;  %v48_v51 = vld [vmem:[%s2966_s0 + $0xc0] sm:$0xff]  ;;  %v49_v52 = vld [vmem:[%s2966_s0 + $0xc8] sm:$0xff] }
  0x25   :  { %2127 = vmatprep.mubr.msk.f32.mxu0 %vm99_vm0, %v38_v31  ;;  %2349 = vmatpush3.bf16.msra.mxu0 %v2346_v27  ;;  %v50_v53 = vld [vmem:[%s2966_s0 + $0xd0] sm:$0xff]  ;;  %v51_v54 = vld [vmem:[%s2966_s0 + $0xd8] sm:$0xff]  ;;  %v52_v55 = vld [vmem:[%s2966_s0 + $0xe0] sm:$0xff] }
  0x26   :  { %2351 = vmatprep.subr.bf16.mxu0 %v2350_v32  ;;  %v53_v56 = vld [vmem:[%s2966_s0 + $0xe8] sm:$0xff]  ;;  %v54_v57 = vld [vmem:[%s2966_s0 + $0xf0] sm:$0xff]  ;;  %v55_v58 = vld [vmem:[%s2966_s0 + $0xf8] sm:$0xff] }
  0x27   :  { %2381 = vmatpush3.bf16.msra.mxu1 %v2350_v32  ;;  %v56_v59 = vld [vmem:[%s2966_s0 + $0x100] sm:$0xff]  ;;  %v57_v60 = vld [vmem:[%s2966_s0 + $0x108] sm:$0xff]  ;;  %v58_v61 = vld [vmem:[%s2966_s0 + $0x110] sm:$0xff] }
  0x28   :  { %2128 = vmatmul.mubr.msk.f32.gmra.mrb[14].mxu0 %vm99_vm0, %v39_v35  ;;  %2374 = vmatprep.subr.bf16.mxu1 %v2354_v37  ;;  %v59_v62 = vld [vmem:[%s2966_s0 + $0x118] sm:$0xff]  ;;  %v60_v63 = vld [vmem:[%s2966_s0 + $0x120] sm:$0xff]  ;;  %v61_v0 = vld [vmem:[%s2966_s0 + $0x128] sm:$0xff] }
  0x29   :  { %2130 = vmatprep.mubr.msk.f32.mxu0 %vm99_vm0, %v40_v36  ;;  %2353 = vmatpush3.bf16.msra.mxu0 %v2350_v32  ;;  %v62_v1 = vld [vmem:[%s2966_s0 + $0x130] sm:$0xff]  ;;  %v63_v2 = vld [vmem:[%s2966_s0 + $0x138] sm:$0xff]  ;;  %v64_v3 = vld [vmem:[%s2966_s0 + $0x140] sm:$0xff] }
  0x2a   :  { %2355 = vmatprep.subr.bf16.mxu0 %v2354_v37  ;;  %v65_v4 = vld [vmem:[%s2966_s0 + $0x148] sm:$0xff]  ;;  %v66_v5 = vld [vmem:[%s2966_s0 + $0x150] sm:$0xff]  ;;  %v67_v6 = vld [vmem:[%s2966_s0 + $0x158] sm:$0xff] }
  0x2b   :  { %2382 = vmatpush3.bf16.msra.mxu1 %v2354_v37  ;;  %v68_v7 = vld [vmem:[%s2966_s0 + $0x160] sm:$0xff]  ;;  %v755_v8 = vld [vmem:[%s2969_s3 + $0x70] sm:$0xff]  ;;  %v756_v9 = vld [vmem:[%s2969_s3 + $0x78] sm:$0xff] }
  0x2c   :  { %2131 = vmatmul.mubr.msk.f32.gmra.mrb[16].mxu0 %vm99_vm0, %v41_v40  ;;  %2375 = vmatprep.subr.bf16.mxu1 %v2358_v42  ;;  %v2366_v10 = vpack.c.bf16 %v756_v9, %v755_v8  ;;  %v69_v11 = vld [vmem:[%s2966_s0 + $0x168] sm:$0xff]  ;;  %v70_v12 = vld [vmem:[%s2966_s0 + $0x170] sm:$0xff]  ;;  %v71_v13 = vld [vmem:[%s2966_s0 + $0x178] sm:$0xff] }
  0x2d   :  { %2133 = vmatprep.mubr.msk.f32.mxu0 %vm99_vm0, %v42_v41  ;;  %2357 = vmatpush3.bf16.msra.mxu0 %v2354_v37  ;;  %v72_v14 = vld [vmem:[%s2966_s0 + $0x180] sm:$0xff]  ;;  %v73_v15 = vld [vmem:[%s2966_s0 + $0x188] sm:$0xff]  ;;  %v74_v16 = vld [vmem:[%s2966_s0 + $0x190] sm:$0xff] }
  0x2e   :  { %2359 = vmatprep.subr.bf16.mxu0 %v2358_v42  ;;  %v75_v17 = vld [vmem:[%s2966_s0 + $0x198] sm:$0xff]  ;;  %v76_v18 = vld [vmem:[%s2966_s0 + $0x1a0] sm:$0xff]  ;;  %v77_v19 = vld [vmem:[%s2966_s0 + $0x1a8] sm:$0xff] }
  0x2f   :  { %2383 = vmatpush3.bf16.msra.mxu1 %v2358_v42  ;;  %v78_v20 = vld [vmem:[%s2966_s0 + $0x1b0] sm:$0xff]  ;;  %v79_v21 = vld [vmem:[%s2966_s0 + $0x1b8] sm:$0xff]  ;;  %v80_v22 = vld [vmem:[%s2966_s0 + $0x1c0] sm:$0xff] }
  0x30   :  { %2134 = vmatmul.mubr.msk.f32.gmra.mrb[18].mxu0 %vm99_vm0, %v43_v45  ;;  %2376 = vmatprep.subr.bf16.mxu1 %v2362_v47  ;;  %v81_v23 = vld [vmem:[%s2966_s0 + $0x1c8] sm:$0xff]  ;;  %v82_v24 = vld [vmem:[%s2966_s0 + $0x1d0] sm:$0xff]  ;;  %v83_v25 = vld [vmem:[%s2966_s0 + $0x1d8] sm:$0xff] }
  0x31   :  { %2136 = vmatprep.mubr.msk.f32.mxu0 %vm99_vm0, %v44_v46  ;;  %2361 = vmatpush3.bf16.msra.mxu0 %v2358_v42  ;;  %v84_v26 = vld [vmem:[%s2966_s0 + $0x1e0] sm:$0xff]  ;;  %v85_v27 = vld [vmem:[%s2966_s0 + $0x1e8] sm:$0xff]  ;;  %v86_v28 = vld [vmem:[%s2966_s0 + $0x1f0] sm:$0xff] }
  0x32   :  { %2363 = vmatprep.subr.bf16.mxu0 %v2362_v47  ;;  %v87_v29 = vld [vmem:[%s2966_s0 + $0x1f8] sm:$0xff]  ;;  %v2800_v30 = vld [vmem:[%s2968_s2] ss:$0 sm:$0xff] }
  0x33   :  { %2384 = vmatpush3.bf16.msra.mxu1 %v2362_v47 }
  0x34   :  { %2137 = vmatmul.mubr.msk.f32.gmra.mrb[20].mxu0 %vm99_vm0, %v45_v48  ;;  %2377 = vmatprep.subr.bf16.mxu1 %v2366_v10 }
  0x35   :  { %2139 = vmatprep.mubr.msk.f32.mxu0 %vm99_vm0, %v46_v49  ;;  %2365 = vmatpush3.bf16.msra.mxu0 %v2362_v47 }
  0x36   :  { %2367 = vmatprep.subr.bf16.mxu0 %v2366_v10 }
  0x37   :  { %2385 = vmatpush3.bf16.msra.mxu1 %v2366_v10 }
  0x38   :  { %2140 = vmatmul.mubr.msk.f32.gmra.mrb[22].mxu0 %vm99_vm0, %v47_v50 }
  0x39   :  { %2142 = vmatprep.mubr.msk.f32.mxu0 %vm99_vm0, %v48_v51  ;;  %2369 = vmatpush3.bf16.msra.mxu0 %v2366_v10 }
  0x3c   :  { %2143 = vmatmul.mubr.msk.f32.gmra.mrb[24].mxu0 %vm99_vm0, %v49_v52 }
  0x3d   :  { %2145 = vmatprep.mubr.msk.f32.mxu0 %vm99_vm0, %v50_v53 }
  0x40   :  { %2146 = vmatmul.mubr.msk.f32.gmra.mrb[26].mxu0 %vm99_vm0, %v51_v54 }
  0x41   :  { %2148 = vmatprep.mubr.msk.f32.mxu0 %vm99_vm0, %v52_v55 }
  0x44   :  { %2149 = vmatmul.mubr.msk.f32.gmra.mrb[28].mxu0 %vm99_vm0, %v53_v56 }
  0x45   :  { %2151 = vmatprep.mubr.msk.f32.mxu0 %vm99_vm0, %v54_v57 }
  0x48   :  { %2152 = vmatmul.mubr.msk.f32.gmra.mrb[30].mxu0 %vm99_vm0, %v55_v58 }
  0x49   :  { %2154 = vmatprep.mubr.msk.f32.mxu0 %vm99_vm0, %v56_v59 }
  0x4c   :  { %2155 = vmatmul.mubr.msk.f32.gmra.mrb[32].mxu0 %vm99_vm0, %v57_v60 }
  0x4d   :  { %2157 = vmatprep.mubr.msk.f32.mxu0 %vm99_vm0, %v58_v61 }
  0x50   :  { %2158 = vmatmul.mubr.msk.f32.gmra.mrb[34].mxu0 %vm99_vm0, %v59_v62 }
  0x51   :  { %2160 = vmatprep.mubr.msk.f32.mxu0 %vm99_vm0, %v60_v63 }
  0x54   :  { %2161 = vmatmul.mubr.msk.f32.gmra.mrb[36].mxu0 %vm99_vm0, %v61_v0 }
  0x55   :  { %2163 = vmatprep.mubr.msk.f32.mxu0 %vm99_vm0, %v62_v1 }
  0x58   :  { %2164 = vmatmul.mubr.msk.f32.gmra.mrb[38].mxu0 %vm99_vm0, %v63_v2 }
  0x59   :  { %2166 = vmatprep.mubr.msk.f32.mxu0 %vm99_vm0, %v64_v3 }
  0x5c   :  { %2167 = vmatmul.mubr.msk.f32.gmra.mrb[40].mxu0 %vm99_vm0, %v65_v4 }
  0x5d   :  { %2169 = vmatprep.mubr.msk.f32.mxu0 %vm99_vm0, %v66_v5 }
  0x60   :  { %2170 = vmatmul.mubr.msk.f32.gmra.mrb[42].mxu0 %vm99_vm0, %v67_v6 }
  0x61   :  { %2172 = vmatprep.mubr.msk.f32.mxu0 %vm99_vm0, %v68_v7 }
  0x64   :  { %2173 = vmatmul.mubr.msk.f32.gmra.mrb[44].mxu0 %vm99_vm0, %v69_v11 }
  0x65   :  { %2175 = vmatprep.mubr.msk.f32.mxu0 %vm99_vm0, %v70_v12 }
  0x68   :  { %2176 = vmatmul.mubr.msk.f32.gmra.mrb[46].mxu0 %vm99_vm0, %v71_v13 }
  0x69   :  { %2178 = vmatprep.mubr.msk.f32.mxu0 %vm99_vm0, %v72_v14 }
  0x6c   :  { %2179 = vmatmul.mubr.msk.f32.gmra.mrb[48].mxu0 %vm99_vm0, %v73_v15 }
  0x6d   :  { %2181 = vmatprep.mubr.msk.f32.mxu0 %vm99_vm0, %v74_v16 }
  0x70   :  { %2182 = vmatmul.mubr.msk.f32.gmra.mrb[50].mxu0 %vm99_vm0, %v75_v17 }
  0x71   :  { %2184 = vmatprep.mubr.msk.f32.mxu0 %vm99_vm0, %v76_v18 }
  0x74   :  { %2185 = vmatmul.mubr.msk.f32.gmra.mrb[52].mxu0 %vm99_vm0, %v77_v19 }
  0x75   :  { %2187 = vmatprep.mubr.msk.f32.mxu0 %vm99_vm0, %v78_v20 }
  0x78   :  { %2188 = vmatmul.mubr.msk.f32.gmra.mrb[54].mxu0 %vm99_vm0, %v79_v21 }
  0x79   :  { %2190 = vmatprep.mubr.msk.f32.mxu0 %vm99_vm0, %v80_v22 }
  0x7c   :  { %2191 = vmatmul.mubr.msk.f32.gmra.mrb[56].mxu0 %vm99_vm0, %v81_v23 }
  0x7d   :  { %2193 = vmatprep.mubr.msk.f32.mxu0 %vm99_vm0, %v82_v24 }
  0x80   :  { %2194 = vmatmul.mubr.msk.f32.gmra.mrb[58].mxu0 %vm99_vm0, %v83_v25 }
  0x81   :  { %2196 = vmatprep.mubr.msk.f32.mxu0 %vm99_vm0, %v84_v26 }
  0x84   :  { %2197 = vmatmul.mubr.msk.f32.gmra.mrb[60].mxu0 %vm99_vm0, %v85_v27 }
  0x85   :  { %2199 = vmatprep.mubr.msk.f32.mxu0 %vm99_vm0, %v86_v28 }
  0x88   :  { %2200 = vmatmul.mubr.msk.f32.gmra.mrb[62].mxu0 %vm99_vm0, %v87_v29 }
  0xdf   :  { %v2108_v31 = vpop.f32.mrb[0].mxu0 }
  0xe0   :  { %v364_v32 = vadd.f32 %v2108_v31, %v2800_v30  ;;  %v358_v33 = vpop.f32.mrb[1].mxu0 }
  0xe1   :  { %v359_v34 = vadd.f32 %v2800_v30, %v358_v33 }
  0xe2   :  { %v678_v37 = vmax.f32 %v364_v32, 0.0 }
  0xe3   :  { %v677_v35 = vmax.f32 %v359_v34, 0.0  ;;  %v2111_v36 = vpop.f32.mrb[2].mxu0 }
  0xe4   :  { %v374_v38 = vadd.f32 %v2111_v36, %v2800_v30  ;;  %v368_v39 = vpop.f32.mrb[3].mxu0 }
  0xe5   :  { %v369_v40 = vadd.f32 %v2800_v30, %v368_v39  ;;  %2234 = vmatprep.mubr.f32.mxu0 %v677_v35 }
  0xe6   :  { %2235 = vmatmul.mubr.f32.vlgmr.msra.gmra.mrb[64].mxu0 %v678_v37  ;;  %v680_v43 = vmax.f32 %v374_v38, 0.0 }
  0xe7   :  { %v679_v41 = vmax.f32 %v369_v40, 0.0  ;;  %v2114_v42 = vpop.f32.mrb[4].mxu0 }
  0xe8   :  { %v384_v44 = vadd.f32 %v2114_v42, %v2800_v30  ;;  %v378_v45 = vpop.f32.mrb[5].mxu0 }
  0xe9   :  { %v379_v46 = vadd.f32 %v2800_v30, %v378_v45  ;;  %2237 = vmatprep.mubr.f32.mxu0 %v679_v41 }
  0xea   :  { %2238 = vmatmul.mubr.f32.gmra.mrb[66].mxu0 %v680_v43  ;;  %v682_v49 = vmax.f32 %v384_v44, 0.0 }
  0xeb   :  { %v681_v47 = vmax.f32 %v379_v46, 0.0  ;;  %v2117_v48 = vpop.f32.mrb[6].mxu0 }
  0xec   :  { %v394_v50 = vadd.f32 %v2117_v48, %v2800_v30  ;;  %v388_v51 = vpop.f32.mrb[7].mxu0 }
  0xed   :  { %2240 = vmatprep.mubr.f32.mxu0 %v681_v47  ;;  %v389_v52 = vadd.f32 %v2800_v30, %v388_v51 }
  0xee   :  { %2241 = vmatmul.mubr.f32.gmra.mrb[68].mxu0 %v682_v49  ;;  %v684_v55 = vmax.f32 %v394_v50, 0.0 }
  0xef   :  { %v2120_v53 = vpop.f32.mrb[8].mxu0  ;;  %v683_v54 = vmax.f32 %v389_v52, 0.0 }
  0xf0   :  { %v404_v56 = vadd.f32 %v2120_v53, %v2800_v30  ;;  %v398_v57 = vpop.f32.mrb[9].mxu0 }
  0xf1   :  { %v399_v58 = vadd.f32 %v2800_v30, %v398_v57  ;;  %2243 = vmatprep.mubr.f32.mxu1 %v683_v54 }
  0xf2   :  { %2244 = vmatmul.mubr.f32.vlgmr.msra.gmra.mrb[0].mxu1 %v684_v55  ;;  %v686_v61 = vmax.f32 %v404_v56, 0.0 }
  0xf3   :  { %v685_v59 = vmax.f32 %v399_v58, 0.0  ;;  %v2123_v60 = vpop.f32.mrb[10].mxu0 }
  0xf4   :  { %v414_v62 = vadd.f32 %v2123_v60, %v2800_v30  ;;  %v408_v63 = vpop.f32.mrb[11].mxu0 }
  0xf5   :  { %v409_v0 = vadd.f32 %v2800_v30, %v408_v63  ;;  %2246 = vmatprep.mubr.f32.mxu1 %v685_v59 }
  0xf6   :  { %2247 = vmatmul.mubr.f32.gmra.mrb[2].mxu1 %v686_v61  ;;  %v688_v3 = vmax.f32 %v414_v62, 0.0 }
  0xf7   :  { %v687_v1 = vmax.f32 %v409_v0, 0.0  ;;  %v2126_v2 = vpop.f32.mrb[12].mxu0 }
  0xf8   :  { %v424_v4 = vadd.f32 %v2126_v2, %v2800_v30  ;;  %v418_v5 = vpop.f32.mrb[13].mxu0 }
  0xf9   :  { %v419_v6 = vadd.f32 %v2800_v30, %v418_v5  ;;  %2249 = vmatprep.mubr.f32.mxu1 %v687_v1 }
  0xfa   :  { %2250 = vmatmul.mubr.f32.gmra.mrb[4].mxu1 %v688_v3  ;;  %v690_v9 = vmax.f32 %v424_v4, 0.0 }
  0xfb   :  { %v689_v7 = vmax.f32 %v419_v6, 0.0  ;;  %v2129_v8 = vpop.f32.mrb[14].mxu0 }
  0xfc   :  { %v434_v10 = vadd.f32 %v2129_v8, %v2800_v30  ;;  %v428_v11 = vpop.f32.mrb[15].mxu0 }
  0xfd   :  { %v429_v12 = vadd.f32 %v2800_v30, %v428_v11  ;;  %2252 = vmatprep.mubr.f32.mxu1 %v689_v7 }
  0xfe   :  { %2253 = vmatmul.mubr.f32.gmra.mrb[6].mxu1 %v690_v9  ;;  %v692_v15 = vmax.f32 %v434_v10, 0.0 }
  0xff   :  { %v691_v13 = vmax.f32 %v429_v12, 0.0  ;;  %v2132_v14 = vpop.f32.mrb[16].mxu0 }
 0x100   :  { %v444_v16 = vadd.f32 %v2132_v14, %v2800_v30  ;;  %v438_v17 = vpop.f32.mrb[17].mxu0 }
 0x101   :  { %v439_v18 = vadd.f32 %v2800_v30, %v438_v17  ;;  %2255 = vmatprep.mubr.f32.mxu1 %v691_v13 }
 0x102   :  { %2256 = vmatmul.mubr.f32.gmra.mrb[8].mxu1 %v692_v15  ;;  %v694_v21 = vmax.f32 %v444_v16, 0.0 }
 0x103   :  { %v693_v19 = vmax.f32 %v439_v18, 0.0  ;;  %v2135_v20 = vpop.f32.mrb[18].mxu0 }
 0x104   :  { %v454_v22 = vadd.f32 %v2135_v20, %v2800_v30  ;;  %v448_v23 = vpop.f32.mrb[19].mxu0 }
 0x105   :  { %v449_v24 = vadd.f32 %v2800_v30, %v448_v23  ;;  %2258 = vmatprep.mubr.f32.mxu1 %v693_v19 }
 0x106   :  { %2259 = vmatmul.mubr.f32.gmra.mrb[10].mxu1 %v694_v21  ;;  %v696_v27 = vmax.f32 %v454_v22, 0.0 }
 0x107   :  { %v695_v25 = vmax.f32 %v449_v24, 0.0  ;;  %v2138_v26 = vpop.f32.mrb[20].mxu0 }
 0x108   :  { %v464_v28 = vadd.f32 %v2138_v26, %v2800_v30  ;;  %v458_v29 = vpop.f32.mrb[21].mxu0 }
 0x109   :  { %v459_v31 = vadd.f32 %v2800_v30, %v458_v29  ;;  %2261 = vmatprep.mubr.f32.mxu1 %v695_v25 }
 0x10a   :  { %2262 = vmatmul.mubr.f32.gmra.mrb[12].mxu1 %v696_v27  ;;  %v698_v34 = vmax.f32 %v464_v28, 0.0 }
 0x10b   :  { %v697_v32 = vmax.f32 %v459_v31, 0.0  ;;  %v2141_v33 = vpop.f32.mrb[22].mxu0 }
 0x10c   :  { %v474_v35 = vadd.f32 %v2141_v33, %v2800_v30  ;;  %v468_v36 = vpop.f32.mrb[23].mxu0 }
 0x10d   :  { %v469_v37 = vadd.f32 %v2800_v30, %v468_v36  ;;  %2264 = vmatprep.mubr.f32.mxu1 %v697_v32 }
 0x10e   :  { %2265 = vmatmul.mubr.f32.gmra.mrb[14].mxu1 %v698_v34  ;;  %v700_v40 = vmax.f32 %v474_v35, 0.0 }
 0x10f   :  { %v699_v38 = vmax.f32 %v469_v37, 0.0  ;;  %v2144_v39 = vpop.f32.mrb[24].mxu0 }
 0x110   :  { %v484_v41 = vadd.f32 %v2144_v39, %v2800_v30  ;;  %v478_v42 = vpop.f32.mrb[25].mxu0 }
 0x111   :  { %v479_v43 = vadd.f32 %v2800_v30, %v478_v42  ;;  %2267 = vmatprep.mubr.f32.mxu1 %v699_v38 }
 0x112   :  { %2268 = vmatmul.mubr.f32.gmra.mrb[16].mxu1 %v700_v40  ;;  %v702_v46 = vmax.f32 %v484_v41, 0.0 }
 0x113   :  { %v701_v44 = vmax.f32 %v479_v43, 0.0  ;;  %v2147_v45 = vpop.f32.mrb[26].mxu0 }
 0x114   :  { %v494_v47 = vadd.f32 %v2147_v45, %v2800_v30  ;;  %v488_v48 = vpop.f32.mrb[27].mxu0 }
 0x115   :  { %v489_v49 = vadd.f32 %v2800_v30, %v488_v48  ;;  %2270 = vmatprep.mubr.f32.mxu1 %v701_v44 }
 0x116   :  { %2271 = vmatmul.mubr.f32.gmra.mrb[18].mxu1 %v702_v46  ;;  %v704_v52 = vmax.f32 %v494_v47, 0.0 }
 0x117   :  { %v703_v50 = vmax.f32 %v489_v49, 0.0  ;;  %v2150_v51 = vpop.f32.mrb[28].mxu0 }
 0x118   :  { %v504_v53 = vadd.f32 %v2150_v51, %v2800_v30  ;;  %v498_v54 = vpop.f32.mrb[29].mxu0 }
 0x119   :  { %v499_v55 = vadd.f32 %v2800_v30, %v498_v54  ;;  %2273 = vmatprep.mubr.f32.mxu1 %v703_v50 }
 0x11a   :  { %2274 = vmatmul.mubr.f32.gmra.mrb[20].mxu1 %v704_v52  ;;  %v706_v58 = vmax.f32 %v504_v53, 0.0 }
 0x11b   :  { %v705_v56 = vmax.f32 %v499_v55, 0.0  ;;  %v2153_v57 = vpop.f32.mrb[30].mxu0 }
 0x11c   :  { %v514_v59 = vadd.f32 %v2153_v57, %v2800_v30  ;;  %v508_v60 = vpop.f32.mrb[31].mxu0 }
 0x11d   :  { %v509_v61 = vadd.f32 %v2800_v30, %v508_v60  ;;  %2276 = vmatprep.mubr.f32.mxu1 %v705_v56 }
 0x11e   :  { %2277 = vmatmul.mubr.f32.gmra.mrb[22].mxu1 %v706_v58  ;;  %v708_v0 = vmax.f32 %v514_v59, 0.0 }
 0x11f   :  { %v707_v62 = vmax.f32 %v509_v61, 0.0  ;;  %v2156_v63 = vpop.f32.mrb[32].mxu0 }
 0x120   :  { %v524_v1 = vadd.f32 %v2156_v63, %v2800_v30  ;;  %v518_v2 = vpop.f32.mrb[33].mxu0 }
 0x121   :  { %v519_v3 = vadd.f32 %v2800_v30, %v518_v2  ;;  %2279 = vmatprep.mubr.f32.mxu1 %v707_v62 }
 0x122   :  { %2280 = vmatmul.mubr.f32.gmra.mrb[24].mxu1 %v708_v0  ;;  %v710_v6 = vmax.f32 %v524_v1, 0.0 }
 0x123   :  { %v709_v4 = vmax.f32 %v519_v3, 0.0  ;;  %v2159_v5 = vpop.f32.mrb[34].mxu0 }
 0x124   :  { %v534_v7 = vadd.f32 %v2159_v5, %v2800_v30  ;;  %v528_v8 = vpop.f32.mrb[35].mxu0 }
 0x125   :  { %v529_v9 = vadd.f32 %v2800_v30, %v528_v8  ;;  %2282 = vmatprep.mubr.f32.mxu1 %v709_v4 }
 0x126   :  { %2283 = vmatmul.mubr.f32.gmra.mrb[26].mxu1 %v710_v6  ;;  %v712_v12 = vmax.f32 %v534_v7, 0.0 }
 0x127   :  { %v711_v10 = vmax.f32 %v529_v9, 0.0  ;;  %v2162_v11 = vpop.f32.mrb[36].mxu0 }
 0x128   :  { %v544_v13 = vadd.f32 %v2162_v11, %v2800_v30  ;;  %v538_v14 = vpop.f32.mrb[37].mxu0 }
 0x129   :  { %v539_v15 = vadd.f32 %v2800_v30, %v538_v14  ;;  %2285 = vmatprep.mubr.f32.mxu1 %v711_v10 }
 0x12a   :  { %2286 = vmatmul.mubr.f32.gmra.mrb[28].mxu1 %v712_v12  ;;  %v714_v18 = vmax.f32 %v544_v13, 0.0 }
 0x12b   :  { %v713_v16 = vmax.f32 %v539_v15, 0.0  ;;  %v2165_v17 = vpop.f32.mrb[38].mxu0 }
 0x12c   :  { %v554_v19 = vadd.f32 %v2165_v17, %v2800_v30  ;;  %v548_v20 = vpop.f32.mrb[39].mxu0 }
 0x12d   :  { %v549_v21 = vadd.f32 %v2800_v30, %v548_v20  ;;  %2288 = vmatprep.mubr.f32.mxu1 %v713_v16 }
 0x12e   :  { %2289 = vmatmul.mubr.f32.gmra.mrb[30].mxu1 %v714_v18  ;;  %v716_v24 = vmax.f32 %v554_v19, 0.0 }
 0x12f   :  { %v715_v22 = vmax.f32 %v549_v21, 0.0  ;;  %v2168_v23 = vpop.f32.mrb[40].mxu0 }
 0x130   :  { %v564_v25 = vadd.f32 %v2168_v23, %v2800_v30  ;;  %v558_v26 = vpop.f32.mrb[41].mxu0 }
 0x131   :  { %v559_v27 = vadd.f32 %v2800_v30, %v558_v26  ;;  %2291 = vmatprep.mubr.f32.mxu1 %v715_v22 }
 0x132   :  { %2292 = vmatmul.mubr.f32.gmra.mrb[32].mxu1 %v716_v24  ;;  %v718_v31 = vmax.f32 %v564_v25, 0.0 }
 0x133   :  { %v717_v28 = vmax.f32 %v559_v27, 0.0  ;;  %v2171_v29 = vpop.f32.mrb[42].mxu0 }
 0x134   :  { %v574_v32 = vadd.f32 %v2171_v29, %v2800_v30  ;;  %v568_v33 = vpop.f32.mrb[43].mxu0 }
 0x135   :  { %v569_v34 = vadd.f32 %v2800_v30, %v568_v33  ;;  %2294 = vmatprep.mubr.f32.mxu1 %v717_v28 }
 0x136   :  { %2295 = vmatmul.mubr.f32.gmra.mrb[34].mxu1 %v718_v31  ;;  %v720_v37 = vmax.f32 %v574_v32, 0.0 }
 0x137   :  { %v719_v35 = vmax.f32 %v569_v34, 0.0  ;;  %v2174_v36 = vpop.f32.mrb[44].mxu0  ;;  %v2869_v34 = vld [vmem:[%s2970_s4] ss:$0 sm:$0xff]  ;;  %s2440_s4 = smov [#allocation2]  }
 0x138   :  { %v584_v38 = vadd.f32 %v2174_v36, %v2800_v30  ;;  %v578_v39 = vpop.f32.mrb[45].mxu0  ;;  %s1538_s14 = sshll.u32 %s2440_s4, 4  ;;  %s1539_s14 = int_to_ptr.vmem [resolvable:$true] %s1538_s14 }
 0x139   :  { %v579_v40 = vadd.f32 %v2800_v30, %v578_v39  ;;  %2297 = vmatprep.mubr.f32.mxu1 %v719_v35  ;;  %s2392_s17 = scalar_lea.vmem %s1539_s14, 8192  ;;  %p2397_p1 = scmp.lt.s32.totalorder %s1539_s14, %s1539_s14 }
 0x13a   :  { %2298 = vmatmul.mubr.f32.gmra.mrb[36].mxu1 %v720_v37  ;;  %v722_v43 = vmax.f32 %v584_v38, 0.0  ;;  %p2393_p0 = scmp.ne.s32.totalorder %s1539_s14, %s2392_s17  ;;  %p2398_p2 = scmp.lt.s32.totalorder %s2392_s17, %s2392_s17 }
 0x13b   :  { %v721_v41 = vmax.f32 %v579_v40, 0.0  ;;  %v2177_v42 = vpop.f32.mrb[46].mxu0 }
 0x13c   :  { %v594_v44 = vadd.f32 %v2177_v42, %v2800_v30  ;;  %v588_v45 = vpop.f32.mrb[47].mxu0  ;;  %p2399_p3 = por %p2398_p2, %p2397_p1 }
 0x13d   :  { %v589_v46 = vadd.f32 %v2800_v30, %v588_v45  ;;  %2300 = vmatprep.mubr.f32.mxu1 %v721_v41 }
 0x13e   :  { %2301 = vmatmul.mubr.f32.gmra.mrb[38].mxu1 %v722_v43  ;;  %v724_v49 = vmax.f32 %v594_v44, 0.0  ;;  %p2400_p4 = pnand %p2399_p3, %p2393_p0 }
 0x13f   :  { %v723_v47 = vmax.f32 %v589_v46, 0.0  ;;  %v2180_v48 = vpop.f32.mrb[48].mxu0 }
 0x140   :  { %v604_v50 = vadd.f32 %v2180_v48, %v2800_v30  ;;  %v598_v51 = vpop.f32.mrb[49].mxu0 }
 0x141   :  { %v599_v52 = vadd.f32 %v2800_v30, %v598_v51  ;;  %2303 = vmatprep.mubr.f32.mxu1 %v723_v47 }
 0x142   :  { %2304 = vmatmul.mubr.f32.gmra.mrb[40].mxu1 %v724_v49  ;;  %v726_v55 = vmax.f32 %v604_v50, 0.0 }
 0x143   :  { %v725_v53 = vmax.f32 %v599_v52, 0.0  ;;  %v2183_v54 = vpop.f32.mrb[50].mxu0 }
 0x144   :  { %v614_v56 = vadd.f32 %v2183_v54, %v2800_v30  ;;  %v608_v57 = vpop.f32.mrb[51].mxu0 }
 0x145   :  { %v609_v58 = vadd.f32 %v2800_v30, %v608_v57  ;;  %2306 = vmatprep.mubr.f32.mxu1 %v725_v53 }
 0x146   :  { %2307 = vmatmul.mubr.f32.gmra.mrb[42].mxu1 %v726_v55  ;;  %v728_v61 = vmax.f32 %v614_v56, 0.0 }
 0x147   :  { %v727_v59 = vmax.f32 %v609_v58, 0.0  ;;  %v2186_v60 = vpop.f32.mrb[52].mxu0 }
 0x148   :  { %v624_v62 = vadd.f32 %v2186_v60, %v2800_v30  ;;  %v618_v63 = vpop.f32.mrb[53].mxu0 }
 0x149   :  { %v619_v0 = vadd.f32 %v2800_v30, %v618_v63  ;;  %2309 = vmatprep.mubr.f32.mxu1 %v727_v59 }
 0x14a   :  { %2310 = vmatmul.mubr.f32.gmra.mrb[44].mxu1 %v728_v61  ;;  %v730_v3 = vmax.f32 %v624_v62, 0.0 }
 0x14b   :  { %v729_v1 = vmax.f32 %v619_v0, 0.0  ;;  %v2189_v2 = vpop.f32.mrb[54].mxu0 }
 0x14c   :  { %v634_v4 = vadd.f32 %v2189_v2, %v2800_v30  ;;  %v628_v5 = vpop.f32.mrb[55].mxu0 }
 0x14d   :  { %v629_v6 = vadd.f32 %v2800_v30, %v628_v5  ;;  %2312 = vmatprep.mubr.f32.mxu1 %v729_v1 }
 0x14e   :  { %2313 = vmatmul.mubr.f32.gmra.mrb[46].mxu1 %v730_v3  ;;  %v732_v9 = vmax.f32 %v634_v4, 0.0 }
 0x14f   :  { %v731_v7 = vmax.f32 %v629_v6, 0.0  ;;  %v2192_v8 = vpop.f32.mrb[56].mxu0 }
 0x150   :  { %v644_v10 = vadd.f32 %v2192_v8, %v2800_v30  ;;  %v638_v11 = vpop.f32.mrb[57].mxu0 }
 0x151   :  { %v639_v12 = vadd.f32 %v2800_v30, %v638_v11  ;;  %2315 = vmatprep.mubr.f32.mxu1 %v731_v7 }
 0x152   :  { %2316 = vmatmul.mubr.f32.gmra.mrb[48].mxu1 %v732_v9  ;;  %v734_v15 = vmax.f32 %v644_v10, 0.0 }
 0x153   :  { %v733_v13 = vmax.f32 %v639_v12, 0.0  ;;  %v2195_v14 = vpop.f32.mrb[58].mxu0 }
 0x154   :  { %v654_v16 = vadd.f32 %v2195_v14, %v2800_v30  ;;  %v648_v17 = vpop.f32.mrb[59].mxu0 }
 0x155   :  { %v649_v18 = vadd.f32 %v2800_v30, %v648_v17  ;;  %2318 = vmatprep.mubr.f32.mxu1 %v733_v13 }
 0x156   :  { %2319 = vmatmul.mubr.f32.gmra.mrb[50].mxu1 %v734_v15  ;;  %v736_v21 = vmax.f32 %v654_v16, 0.0 }
 0x157   :  { %v735_v19 = vmax.f32 %v649_v18, 0.0  ;;  %v2198_v20 = vpop.f32.mrb[60].mxu0 }
 0x158   :  { %v664_v22 = vadd.f32 %v2198_v20, %v2800_v30  ;;  %v658_v23 = vpop.f32.mrb[61].mxu0 }
 0x159   :  { %v659_v24 = vadd.f32 %v2800_v30, %v658_v23  ;;  %2321 = vmatprep.mubr.f32.mxu1 %v735_v19 }
 0x15a   :  { %2322 = vmatmul.mubr.f32.gmra.mrb[52].mxu1 %v736_v21  ;;  %v738_v27 = vmax.f32 %v664_v22, 0.0 }
 0x15b   :  { %v737_v25 = vmax.f32 %v659_v24, 0.0  ;;  %v2201_v26 = vpop.f32.mrb[62].mxu0 }
 0x15c   :  { %v674_v28 = vadd.f32 %v2201_v26, %v2800_v30  ;;  %v668_v29 = vpop.f32.mrb[63].mxu0 }
 0x15d   :  { %v669_v31 = vadd.f32 %v2800_v30, %v668_v29  ;;  %2324 = vmatprep.mubr.f32.mxu1 %v737_v25 }
 0x15e   :  { %2325 = vmatmul.mubr.f32.gmra.mrb[54].mxu1 %v738_v27  ;;  %v740_v33 = vmax.f32 %v674_v28, 0.0 }
 0x15f   :  { %v739_v32 = vmax.f32 %v669_v31, 0.0 }
 0x161   :  { %2327 = vmatprep.mubr.f32.mxu1 %v739_v32 }
 0x162   :  { %2328 = vmatmul.mubr.f32.gmra.mrb[56].mxu1 %v740_v33 }
 0x1b9   :  { %v2236_v35 = vpop.f32.mrb[64].mxu0 }
 0x1ba   :  { %v836_v36 = vadd.f32 %v2236_v35, %v2869_v34  ;;  %v830_v37 = vpop.f32.mrb[65].mxu0 }
 0x1bb   :  { %v831_v38 = vadd.f32 %v2869_v34, %v830_v37 }
 0x1bc   :  { %1150 = vst [vmem:[#allocation2 + $0x8] sm:$0xff] %v836_v36 }
 0x1bd   :  { %1149 = vst [vmem:[#allocation2] sm:$0xff] %v831_v38  ;;  %v1762_v30 = vpack.c.bf16 %v836_v36, %v831_v38  ;;  %v2239_v39 = vpop.f32.mrb[66].mxu0 }
 0x1be   :  { %v846_v40 = vadd.f32 %v2239_v39, %v2869_v34  ;;  %v840_v41 = vpop.f32.mrb[67].mxu0 }
 0x1bf   :  { %1763 = vst [vmem:[#allocation4] sm:$0xff] %v1762_v30   ;;  %v841_v42 = vadd.f32 %v2869_v34, %v840_v41 }
 0x1c0   :  { %1152 = vst [vmem:[#allocation2 + $0x18] sm:$0xff] %v846_v40 }
 0x1c1   :  { %1151 = vst [vmem:[#allocation2 + $0x10] sm:$0xff] %v841_v42  ;;  %v1767_v43 = vpack.c.bf16 %v846_v40, %v841_v42  ;;  %v2242_v44 = vpop.f32.mrb[68].mxu0 }
 0x1c2   :  { %v856_v45 = vadd.f32 %v2242_v44, %v2869_v34  ;;  %v850_v46 = vpop.f32.mrb[69].mxu0 }
 0x1c3   :  { %1919 = vst [vmem:[#allocation4 + $0x8] sm:$0xff] %v1767_v43   ;;  %v851_v47 = vadd.f32 %v2869_v34, %v850_v46 }
 0x1c4   :  { %1154 = vst [vmem:[#allocation2 + $0x28] sm:$0xff] %v856_v45 }
 0x1c5   :  { %1153 = vst [vmem:[#allocation2 + $0x20] sm:$0xff] %v851_v47  ;;  %v1772_v48 = vpack.c.bf16 %v856_v45, %v851_v47  ;;  %v2245_v49 = vpop.f32.mrb[0].mxu1 }
 0x1c6   :  { %v866_v50 = vadd.f32 %v2245_v49, %v2869_v34  ;;  %v860_v51 = vpop.f32.mrb[1].mxu1 }
 0x1c7   :  { %1920 = vst [vmem:[#allocation4 + $0x10] sm:$0xff] %v1772_v48   ;;  %v861_v52 = vadd.f32 %v2869_v34, %v860_v51 }
 0x1c8   :  { %1156 = vst [vmem:[#allocation2 + $0x38] sm:$0xff] %v866_v50 }
 0x1c9   :  { %1155 = vst [vmem:[#allocation2 + $0x30] sm:$0xff] %v861_v52  ;;  %v1777_v53 = vpack.c.bf16 %v866_v50, %v861_v52  ;;  %v2248_v54 = vpop.f32.mrb[2].mxu1 }
 0x1ca   :  { %v876_v55 = vadd.f32 %v2248_v54, %v2869_v34  ;;  %v870_v56 = vpop.f32.mrb[3].mxu1 }
 0x1cb   :  { %1921 = vst [vmem:[#allocation4 + $0x18] sm:$0xff] %v1777_v53   ;;  %v871_v57 = vadd.f32 %v2869_v34, %v870_v56 }
 0x1cc   :  { %1158 = vst [vmem:[#allocation2 + $0x48] sm:$0xff] %v876_v55 }
 0x1cd   :  { %1157 = vst [vmem:[#allocation2 + $0x40] sm:$0xff] %v871_v57  ;;  %v1782_v58 = vpack.c.bf16 %v876_v55, %v871_v57  ;;  %v2251_v59 = vpop.f32.mrb[4].mxu1 }
 0x1ce   :  { %v886_v60 = vadd.f32 %v2251_v59, %v2869_v34  ;;  %v880_v61 = vpop.f32.mrb[5].mxu1 }
 0x1cf   :  { %1922 = vst [vmem:[#allocation4 + $0x20] sm:$0xff] %v1782_v58   ;;  %v881_v62 = vadd.f32 %v2869_v34, %v880_v61 }
 0x1d0   :  { %1160 = vst [vmem:[#allocation2 + $0x58] sm:$0xff] %v886_v60 }
 0x1d1   :  { %1159 = vst [vmem:[#allocation2 + $0x50] sm:$0xff] %v881_v62  ;;  %v1787_v63 = vpack.c.bf16 %v886_v60, %v881_v62  ;;  %v2254_v0 = vpop.f32.mrb[6].mxu1 }
 0x1d2   :  { %v896_v1 = vadd.f32 %v2254_v0, %v2869_v34  ;;  %v890_v2 = vpop.f32.mrb[7].mxu1 }
 0x1d3   :  { %1923 = vst [vmem:[#allocation4 + $0x28] sm:$0xff] %v1787_v63   ;;  %v891_v3 = vadd.f32 %v2869_v34, %v890_v2 }
 0x1d4   :  { %1162 = vst [vmem:[#allocation2 + $0x68] sm:$0xff] %v896_v1 }
 0x1d5   :  { %1161 = vst [vmem:[#allocation2 + $0x60] sm:$0xff] %v891_v3  ;;  %v1792_v4 = vpack.c.bf16 %v896_v1, %v891_v3  ;;  %v2257_v5 = vpop.f32.mrb[8].mxu1 }
 0x1d6   :  { %v906_v6 = vadd.f32 %v2257_v5, %v2869_v34  ;;  %v900_v7 = vpop.f32.mrb[9].mxu1 }
 0x1d7   :  { %1924 = vst [vmem:[#allocation4 + $0x30] sm:$0xff] %v1792_v4   ;;  %v901_v8 = vadd.f32 %v2869_v34, %v900_v7 }
 0x1d8   :  { %1164 = vst [vmem:[#allocation2 + $0x78] sm:$0xff] %v906_v6 }
 0x1d9   :  { %1163 = vst [vmem:[#allocation2 + $0x70] sm:$0xff] %v901_v8  ;;  %v1797_v9 = vpack.c.bf16 %v906_v6, %v901_v8  ;;  %v2260_v10 = vpop.f32.mrb[10].mxu1 }
 0x1da   :  { %v916_v11 = vadd.f32 %v2260_v10, %v2869_v34  ;;  %v910_v12 = vpop.f32.mrb[11].mxu1 }
 0x1db   :  { %1925 = vst [vmem:[#allocation4 + $0x38] sm:$0xff] %v1797_v9   ;;  %v911_v13 = vadd.f32 %v2869_v34, %v910_v12 }
 0x1dc   :  { %1166 = vst [vmem:[#allocation2 + $0x88] sm:$0xff] %v916_v11 }
 0x1dd   :  { %1165 = vst [vmem:[#allocation2 + $0x80] sm:$0xff] %v911_v13  ;;  %v1802_v14 = vpack.c.bf16 %v916_v11, %v911_v13  ;;  %v2263_v15 = vpop.f32.mrb[12].mxu1 }
 0x1de   :  { %v926_v16 = vadd.f32 %v2263_v15, %v2869_v34  ;;  %v920_v17 = vpop.f32.mrb[13].mxu1 }
 0x1df   :  { %1926 = vst [vmem:[#allocation4 + $0x40] sm:$0xff] %v1802_v14   ;;  %v921_v18 = vadd.f32 %v2869_v34, %v920_v17 }
 0x1e0   :  { %1168 = vst [vmem:[#allocation2 + $0x98] sm:$0xff] %v926_v16 }
 0x1e1   :  { %1167 = vst [vmem:[#allocation2 + $0x90] sm:$0xff] %v921_v18  ;;  %v1807_v19 = vpack.c.bf16 %v926_v16, %v921_v18  ;;  %v2266_v20 = vpop.f32.mrb[14].mxu1 }
 0x1e2   :  { %v936_v21 = vadd.f32 %v2266_v20, %v2869_v34  ;;  %v930_v22 = vpop.f32.mrb[15].mxu1 }
 0x1e3   :  { %1927 = vst [vmem:[#allocation4 + $0x48] sm:$0xff] %v1807_v19   ;;  %v931_v23 = vadd.f32 %v2869_v34, %v930_v22 }
 0x1e4   :  { %1170 = vst [vmem:[#allocation2 + $0xa8] sm:$0xff] %v936_v21 }
 0x1e5   :  { %1169 = vst [vmem:[#allocation2 + $0xa0] sm:$0xff] %v931_v23  ;;  %v1812_v24 = vpack.c.bf16 %v936_v21, %v931_v23  ;;  %v2269_v25 = vpop.f32.mrb[16].mxu1 }
 0x1e6   :  { %v946_v26 = vadd.f32 %v2269_v25, %v2869_v34  ;;  %v940_v27 = vpop.f32.mrb[17].mxu1 }
 0x1e7   :  { %1928 = vst [vmem:[#allocation4 + $0x50] sm:$0xff] %v1812_v24   ;;  %v941_v28 = vadd.f32 %v2869_v34, %v940_v27 }
 0x1e8   :  { %1172 = vst [vmem:[#allocation2 + $0xb8] sm:$0xff] %v946_v26 }
 0x1e9   :  { %1171 = vst [vmem:[#allocation2 + $0xb0] sm:$0xff] %v941_v28  ;;  %v1817_v29 = vpack.c.bf16 %v946_v26, %v941_v28  ;;  %v2272_v31 = vpop.f32.mrb[18].mxu1 }
 0x1ea   :  { %v956_v32 = vadd.f32 %v2272_v31, %v2869_v34  ;;  %v950_v33 = vpop.f32.mrb[19].mxu1 }
 0x1eb   :  { %1929 = vst [vmem:[#allocation4 + $0x58] sm:$0xff] %v1817_v29   ;;  %v951_v35 = vadd.f32 %v2869_v34, %v950_v33 }
 0x1ec   :  { %1174 = vst [vmem:[#allocation2 + $0xc8] sm:$0xff] %v956_v32 }
 0x1ed   :  { %1173 = vst [vmem:[#allocation2 + $0xc0] sm:$0xff] %v951_v35  ;;  %v1822_v36 = vpack.c.bf16 %v956_v32, %v951_v35  ;;  %v2275_v37 = vpop.f32.mrb[20].mxu1 }
 0x1ee   :  { %v966_v38 = vadd.f32 %v2275_v37, %v2869_v34  ;;  %v960_v30 = vpop.f32.mrb[21].mxu1 }
 0x1ef   :  { %1930 = vst [vmem:[#allocation4 + $0x60] sm:$0xff] %v1822_v36   ;;  %v961_v39 = vadd.f32 %v2869_v34, %v960_v30 }
 0x1f0   :  { %1176 = vst [vmem:[#allocation2 + $0xd8] sm:$0xff] %v966_v38 }
 0x1f1   :  { %1175 = vst [vmem:[#allocation2 + $0xd0] sm:$0xff] %v961_v39  ;;  %v1827_v40 = vpack.c.bf16 %v966_v38, %v961_v39  ;;  %v2278_v41 = vpop.f32.mrb[22].mxu1 }
 0x1f2   :  { %v976_v42 = vadd.f32 %v2278_v41, %v2869_v34  ;;  %v970_v43 = vpop.f32.mrb[23].mxu1 }
 0x1f3   :  { %1931 = vst [vmem:[#allocation4 + $0x68] sm:$0xff] %v1827_v40   ;;  %v971_v44 = vadd.f32 %v2869_v34, %v970_v43 }
 0x1f4   :  { %1178 = vst [vmem:[#allocation2 + $0xe8] sm:$0xff] %v976_v42 }
 0x1f5   :  { %1177 = vst [vmem:[#allocation2 + $0xe0] sm:$0xff] %v971_v44  ;;  %v1832_v45 = vpack.c.bf16 %v976_v42, %v971_v44  ;;  %v2281_v46 = vpop.f32.mrb[24].mxu1 }
 0x1f6   :  { %v986_v47 = vadd.f32 %v2281_v46, %v2869_v34  ;;  %v980_v48 = vpop.f32.mrb[25].mxu1 }
 0x1f7   :  { %1932 = vst [vmem:[#allocation4 + $0x70] sm:$0xff] %v1832_v45   ;;  %v981_v49 = vadd.f32 %v2869_v34, %v980_v48 }
 0x1f8   :  { %1180 = vst [vmem:[#allocation2 + $0xf8] sm:$0xff] %v986_v47 }
 0x1f9   :  { %1179 = vst [vmem:[#allocation2 + $0xf0] sm:$0xff] %v981_v49  ;;  %v1837_v50 = vpack.c.bf16 %v986_v47, %v981_v49  ;;  %v2284_v51 = vpop.f32.mrb[26].mxu1 }
 0x1fa   :  { %v996_v52 = vadd.f32 %v2284_v51, %v2869_v34  ;;  %v990_v53 = vpop.f32.mrb[27].mxu1 }
 0x1fb   :  { %1933 = vst [vmem:[#allocation4 + $0x78] sm:$0xff] %v1837_v50   ;;  %v991_v54 = vadd.f32 %v2869_v34, %v990_v53 }
 0x1fc   :  { %1182 = vst [vmem:[#allocation2 + $0x108] sm:$0xff] %v996_v52 }
 0x1fd   :  { %1181 = vst [vmem:[#allocation2 + $0x100] sm:$0xff] %v991_v54  ;;  %v1842_v55 = vpack.c.bf16 %v996_v52, %v991_v54  ;;  %v2287_v56 = vpop.f32.mrb[28].mxu1 }
 0x1fe   :  { %v1006_v57 = vadd.f32 %v2287_v56, %v2869_v34  ;;  %v1000_v58 = vpop.f32.mrb[29].mxu1 }
 0x1ff   :  { %1934 = vst [vmem:[#allocation4 + $0x80] sm:$0xff] %v1842_v55   ;;  %v1001_v59 = vadd.f32 %v2869_v34, %v1000_v58 }
 0x200   :  { %1184 = vst [vmem:[#allocation2 + $0x118] sm:$0xff] %v1006_v57 }
 0x201   :  { %1183 = vst [vmem:[#allocation2 + $0x110] sm:$0xff] %v1001_v59  ;;  %v1847_v60 = vpack.c.bf16 %v1006_v57, %v1001_v59  ;;  %v2290_v61 = vpop.f32.mrb[30].mxu1 }
 0x202   :  { %v1016_v62 = vadd.f32 %v2290_v61, %v2869_v34  ;;  %v1010_v63 = vpop.f32.mrb[31].mxu1 }
 0x203   :  { %1935 = vst [vmem:[#allocation4 + $0x88] sm:$0xff] %v1847_v60   ;;  %v1011_v0 = vadd.f32 %v2869_v34, %v1010_v63 }
 0x204   :  { %1186 = vst [vmem:[#allocation2 + $0x128] sm:$0xff] %v1016_v62 }
 0x205   :  { %1185 = vst [vmem:[#allocation2 + $0x120] sm:$0xff] %v1011_v0  ;;  %v1852_v1 = vpack.c.bf16 %v1016_v62, %v1011_v0  ;;  %v2293_v2 = vpop.f32.mrb[32].mxu1 }
 0x206   :  { %v1026_v3 = vadd.f32 %v2293_v2, %v2869_v34  ;;  %v1020_v4 = vpop.f32.mrb[33].mxu1 }
 0x207   :  { %1936 = vst [vmem:[#allocation4 + $0x90] sm:$0xff] %v1852_v1   ;;  %v1021_v5 = vadd.f32 %v2869_v34, %v1020_v4 }
 0x208   :  { %1188 = vst [vmem:[#allocation2 + $0x138] sm:$0xff] %v1026_v3 }
 0x209   :  { %1187 = vst [vmem:[#allocation2 + $0x130] sm:$0xff] %v1021_v5  ;;  %v1857_v6 = vpack.c.bf16 %v1026_v3, %v1021_v5  ;;  %v2296_v7 = vpop.f32.mrb[34].mxu1 }
 0x20a   :  { %v1036_v8 = vadd.f32 %v2296_v7, %v2869_v34  ;;  %v1030_v9 = vpop.f32.mrb[35].mxu1 }
 0x20b   :  { %1937 = vst [vmem:[#allocation4 + $0x98] sm:$0xff] %v1857_v6   ;;  %v1031_v10 = vadd.f32 %v2869_v34, %v1030_v9 }
 0x20c   :  { %1190 = vst [vmem:[#allocation2 + $0x148] sm:$0xff] %v1036_v8 }
 0x20d   :  { %1189 = vst [vmem:[#allocation2 + $0x140] sm:$0xff] %v1031_v10  ;;  %v1862_v11 = vpack.c.bf16 %v1036_v8, %v1031_v10  ;;  %v2299_v12 = vpop.f32.mrb[36].mxu1 }
 0x20e   :  { %v1046_v13 = vadd.f32 %v2299_v12, %v2869_v34  ;;  %v1040_v14 = vpop.f32.mrb[37].mxu1 }
 0x20f   :  { %1938 = vst [vmem:[#allocation4 + $0xa0] sm:$0xff] %v1862_v11   ;;  %v1041_v15 = vadd.f32 %v2869_v34, %v1040_v14 }
 0x210   :  { %1192 = vst [vmem:[#allocation2 + $0x158] sm:$0xff] %v1046_v13 }
 0x211   :  { %1191 = vst [vmem:[#allocation2 + $0x150] sm:$0xff] %v1041_v15  ;;  %v1867_v16 = vpack.c.bf16 %v1046_v13, %v1041_v15  ;;  %v2302_v17 = vpop.f32.mrb[38].mxu1 }
 0x212   :  { %v1056_v18 = vadd.f32 %v2302_v17, %v2869_v34  ;;  %v1050_v19 = vpop.f32.mrb[39].mxu1 }
 0x213   :  { %1939 = vst [vmem:[#allocation4 + $0xa8] sm:$0xff] %v1867_v16   ;;  %v1051_v20 = vadd.f32 %v2869_v34, %v1050_v19 }
 0x214   :  { %1194 = vst [vmem:[#allocation2 + $0x168] sm:$0xff] %v1056_v18 }
 0x215   :  { %1193 = vst [vmem:[#allocation2 + $0x160] sm:$0xff] %v1051_v20  ;;  %v1872_v21 = vpack.c.bf16 %v1056_v18, %v1051_v20  ;;  %v2305_v22 = vpop.f32.mrb[40].mxu1 }
 0x216   :  { %v1066_v23 = vadd.f32 %v2305_v22, %v2869_v34  ;;  %v1060_v24 = vpop.f32.mrb[41].mxu1 }
 0x217   :  { %1940 = vst [vmem:[#allocation4 + $0xb0] sm:$0xff] %v1872_v21   ;;  %v1061_v25 = vadd.f32 %v2869_v34, %v1060_v24 }
 0x218   :  { %1196 = vst [vmem:[#allocation2 + $0x178] sm:$0xff] %v1066_v23 }
 0x219   :  { %1195 = vst [vmem:[#allocation2 + $0x170] sm:$0xff] %v1061_v25  ;;  %v1877_v26 = vpack.c.bf16 %v1066_v23, %v1061_v25  ;;  %v2308_v27 = vpop.f32.mrb[42].mxu1 }
 0x21a   :  { %v1076_v28 = vadd.f32 %v2308_v27, %v2869_v34  ;;  %v1070_v29 = vpop.f32.mrb[43].mxu1 }
 0x21b   :  { %1941 = vst [vmem:[#allocation4 + $0xb8] sm:$0xff] %v1877_v26   ;;  %v1071_v31 = vadd.f32 %v2869_v34, %v1070_v29 }
 0x21c   :  { %1198 = vst [vmem:[#allocation2 + $0x188] sm:$0xff] %v1076_v28 }
 0x21d   :  { %1197 = vst [vmem:[#allocation2 + $0x180] sm:$0xff] %v1071_v31  ;;  %v1882_v32 = vpack.c.bf16 %v1076_v28, %v1071_v31  ;;  %v2311_v33 = vpop.f32.mrb[44].mxu1 }
 0x21e   :  { %v1086_v35 = vadd.f32 %v2311_v33, %v2869_v34  ;;  %v1080_v36 = vpop.f32.mrb[45].mxu1 }
 0x21f   :  { %1942 = vst [vmem:[#allocation4 + $0xc0] sm:$0xff] %v1882_v32   ;;  %v1081_v37 = vadd.f32 %v2869_v34, %v1080_v36 }
 0x220   :  { %1200 = vst [vmem:[#allocation2 + $0x198] sm:$0xff] %v1086_v35 }
 0x221   :  { %1199 = vst [vmem:[#allocation2 + $0x190] sm:$0xff] %v1081_v37  ;;  %v1887_v38 = vpack.c.bf16 %v1086_v35, %v1081_v37  ;;  %v2314_v30 = vpop.f32.mrb[46].mxu1 }
 0x222   :  { %v1096_v39 = vadd.f32 %v2314_v30, %v2869_v34  ;;  %v1090_v40 = vpop.f32.mrb[47].mxu1 }
 0x223   :  { %1943 = vst [vmem:[#allocation4 + $0xc8] sm:$0xff] %v1887_v38   ;;  %v1091_v41 = vadd.f32 %v2869_v34, %v1090_v40 }
 0x224   :  { %1202 = vst [vmem:[#allocation2 + $0x1a8] sm:$0xff] %v1096_v39 }
 0x225   :  { %1201 = vst [vmem:[#allocation2 + $0x1a0] sm:$0xff] %v1091_v41  ;;  %v1892_v42 = vpack.c.bf16 %v1096_v39, %v1091_v41  ;;  %v2317_v43 = vpop.f32.mrb[48].mxu1 }
 0x226   :  { %v1106_v44 = vadd.f32 %v2317_v43, %v2869_v34  ;;  %v1100_v45 = vpop.f32.mrb[49].mxu1 }
 0x227   :  { %1944 = vst [vmem:[#allocation4 + $0xd0] sm:$0xff] %v1892_v42   ;;  %v1101_v46 = vadd.f32 %v2869_v34, %v1100_v45 }
 0x228   :  { %1204 = vst [vmem:[#allocation2 + $0x1b8] sm:$0xff] %v1106_v44 }
 0x229   :  { %1203 = vst [vmem:[#allocation2 + $0x1b0] sm:$0xff] %v1101_v46  ;;  %v1897_v47 = vpack.c.bf16 %v1106_v44, %v1101_v46  ;;  %v2320_v48 = vpop.f32.mrb[50].mxu1 }
 0x22a   :  { %v1116_v49 = vadd.f32 %v2320_v48, %v2869_v34  ;;  %v1110_v50 = vpop.f32.mrb[51].mxu1 }
 0x22b   :  { %1945 = vst [vmem:[#allocation4 + $0xd8] sm:$0xff] %v1897_v47   ;;  %v1111_v51 = vadd.f32 %v2869_v34, %v1110_v50 }
 0x22c   :  { %1206 = vst [vmem:[#allocation2 + $0x1c8] sm:$0xff] %v1116_v49 }
 0x22d   :  { %1205 = vst [vmem:[#allocation2 + $0x1c0] sm:$0xff] %v1111_v51  ;;  %v1902_v52 = vpack.c.bf16 %v1116_v49, %v1111_v51  ;;  %v2323_v53 = vpop.f32.mrb[52].mxu1 }
 0x22e   :  { %v1126_v54 = vadd.f32 %v2323_v53, %v2869_v34  ;;  %v1120_v55 = vpop.f32.mrb[53].mxu1 }
 0x22f   :  { %1946 = vst [vmem:[#allocation4 + $0xe0] sm:$0xff] %v1902_v52   ;;  %v1121_v56 = vadd.f32 %v2869_v34, %v1120_v55 }
 0x230   :  { %1208 = vst [vmem:[#allocation2 + $0x1d8] sm:$0xff] %v1126_v54 }
 0x231   :  { %1207 = vst [vmem:[#allocation2 + $0x1d0] sm:$0xff] %v1121_v56  ;;  %v1907_v57 = vpack.c.bf16 %v1126_v54, %v1121_v56  ;;  %v2326_v58 = vpop.f32.mrb[54].mxu1 }
 0x232   :  { %v1136_v59 = vadd.f32 %v2326_v58, %v2869_v34  ;;  %v1130_v60 = vpop.f32.mrb[55].mxu1 }
 0x233   :  { %1947 = vst [vmem:[#allocation4 + $0xe8] sm:$0xff] %v1907_v57   ;;  %v1131_v61 = vadd.f32 %v2869_v34, %v1130_v60 }
 0x234   :  { %1210 = vst [vmem:[#allocation2 + $0x1e8] sm:$0xff] %v1136_v59 }
 0x235   :  { %1209 = vst [vmem:[#allocation2 + $0x1e0] sm:$0xff] %v1131_v61  ;;  %v1912_v62 = vpack.c.bf16 %v1136_v59, %v1131_v61  ;;  %v2329_v63 = vpop.f32.mrb[56].mxu1 }
 0x236   :  { %v1146_v0 = vadd.f32 %v2329_v63, %v2869_v34  ;;  %v1140_v1 = vpop.f32.mrb[57].mxu1 }
 0x237   :  { %1948 = vst [vmem:[#allocation4 + $0xf0] sm:$0xff] %v1912_v62   ;;  %v1141_v2 = vadd.f32 %v2869_v34, %v1140_v1 }
 0x238   :  { %1212 = vst [vmem:[#allocation2 + $0x1f8] sm:$0xff] %v1146_v0 }
 0x239   :  { %1211 = vst [vmem:[#allocation2 + $0x1f0] sm:$0xff] %v1141_v2  ;;  %v1917_v3 = vpack.c.bf16 %v1146_v0, %v1141_v2 }
 0x23a   :  { %2403 = shalt.err (!%p2400_p4)
}
 0x23b   :  { %s2404_s20 = scalar_lea.hbm %s2971_s5, 8192 }
 0x23c   :  { %p2405_p5 = scmp.ne.s32.totalorder %s2971_s5, %s2404_s20  ;;  %p2408_p6 = scmp.lt.u32.totalorder %s2404_s20, %s2971_s5 }
 0x23e   :  { %p2410_p7 = pnand %p2408_p6, %p2405_p5 }
 0x240   :  { %2413 = shalt.err (!%p2410_p7)
}
 0x241   :  { %s2442_s25 = smov 128   ;;  %s2443_s26 = smov 8   ;;  %1949 = vst [vmem:[#allocation4 + $0xf8] sm:$0xff] %v1917_v3  }
 0x242   :  { %1544 = dma.vmem_to_hbm [thread:$0]  %s1539_s14, 8192, %s2971_s5, [#allocation3], %s2442_s25, %s2442_s25, %s2443_s26  }
 0x243   :  { %s2414_s29 = scalar_lea.vmem %s2935_s16, 4096  ;;  %p2419_p9 = scmp.lt.s32.totalorder %s2935_s16, %s2935_s16 }
 0x244   :  { %p2415_p8 = scmp.ne.s32.totalorder %s2935_s16, %s2414_s29  ;;  %p2420_p10 = scmp.lt.s32.totalorder %s2414_s29, %s2414_s29 }
 0x246   :  { %p2421_p11 = por %p2420_p10, %p2419_p9 }
 0x248   :  { %p2422_p12 = pnand %p2421_p11, %p2415_p8 }
 0x24a   :  { %2425 = shalt.err (!%p2422_p12)
}
 0x24b   :  { %s2426_s7 = scalar_lea.hbm %s2972_s6, 4096 }
 0x24c   :  { %p2427_p13 = scmp.ne.s32.totalorder %s2972_s6, %s2426_s7  ;;  %p2430_p0 = scmp.lt.u32.totalorder %s2426_s7, %s2972_s6 }
 0x24e   :  { %p2432_p1 = pnand %p2430_p0, %p2427_p13 }
 0x250   :  { %2435 = shalt.err (!%p2432_p1)
}
 0x251   :  { %s2444_s5 = smov 64   ;;  %s2445_s11 = smov 4  }
 0x252   :  { %1556 = dma.vmem_to_hbm [thread:$0]  %s2935_s16, 4096, %s2972_s6, [#allocation5], %s2444_s5, %s2444_s5, %s2445_s11  }
 0x253   :  { %2436 = dma.done.wait [#allocation3], 8192  }
 0x254   :  { %2437 = vsyncadd [#allocation3], 4294959104 }
 0x255   :  { %2438 = dma.done.wait [#allocation5], 4096  }
 0x256   :  { %2439 = vsyncadd [#allocation5], 4294963200 }
 0x257   :  { %1563 = vsyncpa [#allocation3], 1 }
 0x258   :  { %1564 = vsyncpa [#allocation5], 1 }

</bundles_post_ra>
